<compile_context>
chip_gen: v6e
topology: v6e:2x2x1
jax: 0.10.0
libtpu: 0.0.40
codegen_flags: <defaults>
</compile_context>

<pallas_src>
import jax
import jax.numpy as jnp
from jax.experimental import pallas as pl
from jax.experimental.pallas import tpu as pltpu


def transition_block1_kernel(x_ref, scale_ref, bias_ref, w_ref, o_ref):
    # x_ref:     (1, 4, TILE_S, Cin_p)  bf16, 4 slabs = positions of each 2x2 window
    # scale_ref: (1, Cin_p)             f32 folded BN scale (gamma / sqrt(var+eps))
    # bias_ref:  (1, Cin_p)             f32 folded BN bias  (beta - mean*scale)
    # w_ref:     (Cin_p, Cout_p)        bf16 1x1 conv-transpose weight * 0.25
    # o_ref:     (1, TILE_S, Cout_p)    pooled + projected output tile (f32)
    x = x_ref[0]                       # (4, TILE_S, Cin_p) bf16
    s = scale_ref[...]                 # (1, Cin_p) f32
    b = bias_ref[...]                  # (1, Cin_p) f32
    # BatchNorm (eval, folded) + ReLU in f32 (bf16*f32 promotes), then the 2x2
    # average pool as a running sum over the 4 window slabs (1/4 is folded
    # into the weight).  Slab-by-slab keeps f32 temps at (TILE_S, Cin_p).
    pooled = jnp.maximum(x[0] * s + b, 0.0)
    pooled = pooled + jnp.maximum(x[1] * s + b, 0.0)
    pooled = pooled + jnp.maximum(x[2] * s + b, 0.0)
    pooled = pooled + jnp.maximum(x[3] * s + b, 0.0)              # (TILE_S, Cin_p)
    # 1x1 ConvTranspose2d (stride 1, pad 0, no bias) == channel matmul on the
    # MXU; bf16 operands, f32 accumulation.
    y = jnp.dot(pooled.astype(w_ref.dtype), w_ref[...],
                preferred_element_type=jnp.float32)               # (TILE_S, Cout_p)
    o_ref[0] = y.astype(o_ref.dtype)


def _round_up(x, m):
    return ((x + m - 1) // m) * m


def _pick_spatial_tile(hw4, cin_p, cout_p, n):
    """Spatial tile (multiple of 8) sized against the double-buffered footprint.

    Footprint per spatial row: 2 x (4 window slabs * Cin_p * bf16) input
    + 2 x (Cout_p * f32) output.  Weight/scale/bias double buffers are tiny
    and covered by the headroom between the block budget and vmem_limit_bytes.
    """
    row_bytes = 2 * (4 * cin_p * 2) + 2 * (cout_p * 4)
    budget = 12 * 1024 * 1024                 # blocks only; limit is 32 MiB
    max_rows = max(8, budget // row_bytes)
    # >= 2 grid steps when N == 1 so both v7x TensorCores get work.
    cap = hw4 if n > 1 else max(8, hw4 // 2)
    cap = min(cap, max_rows, 2048)
    cap = max(8, (cap // 8) * 8)
    # Prefer a tile that divides hw4 exactly (no padded rows); else take cap
    # and pad hw4 up to a multiple of it in the wrapper.
    for t in (2048, 1024, 512, 256, 128, 64, 32, 16, 8):
        if t <= cap and hw4 % t == 0:
            return t
    return cap


@jax.jit
def transition_block1(x_nchw, gamma, beta, run_mean, run_var, weight_io,
                      eps=1e-5):
    """Forward pass of TransitionBlock1 (dropRate=0.0, eval-mode BN).

    x_nchw:    (N, Cin, H, W) float32   (H, W even, as implied by AvgPool2d(2))
    gamma/beta/run_mean/run_var: (Cin,)
    weight_io: (Cin, Cout)  -- ConvTranspose2d(kernel=1) weight squeezed
    returns:   (N, Cout, H//2, W//2) float32
    """
    N, Cin, H, W = x_nchw.shape
    Cout = weight_io.shape[1]
    assert H % 2 == 0 and W % 2 == 0, "AvgPool2d(2) path assumes even H and W"
    H2, W2 = H // 2, W // 2
    HW4 = H2 * W2

    # Pad channels to full 128-lane width (zeros: padded inputs/weights
    # contribute exactly zero to the real outputs).
    Cin_p = _round_up(Cin, 128)
    Cout_p = _round_up(Cout, 128)

    tile_s = _pick_spatial_tile(HW4, Cin_p, Cout_p, N)
    grid_s = pl.cdiv(HW4, tile_s)
    HW4_p = grid_s * tile_s

    # Fold BatchNorm (eval mode) into per-channel scale/bias, padded to Cin_p.
    scale = (gamma / jnp.sqrt(run_var + eps)).astype(jnp.float32)
    bias = beta.astype(jnp.float32) - run_mean.astype(jnp.float32) * scale
    scale_p = jnp.zeros((1, Cin_p), jnp.float32).at[0, :Cin].set(scale)
    bias_p = jnp.zeros((1, Cin_p), jnp.float32).at[0, :Cin].set(bias)

    # Fold the AvgPool 1/4 into the weight (in f32), pad, then cast to bf16.
    w_p = jnp.zeros((Cin_p, Cout_p), jnp.float32)
    w_p = w_p.at[:Cin, :Cout].set(weight_io.astype(jnp.float32) * 0.25)
    w_bf16 = w_p.astype(jnp.bfloat16)

    # Repack NCHW -> (N, 4, HW4_p, Cin_p) bf16: window-position major, channels
    # last.  The bf16 cast and the channel/spatial zero-pad are fused into this
    # single (half-width) repack copy under jit.
    x_nhwc = jnp.transpose(x_nchw, (0, 2, 3, 1)).astype(jnp.bfloat16)  # (N,H,W,C)
    x_blk = x_nhwc.reshape(N, H2, 2, W2, 2, Cin)
    x_blk = jnp.transpose(x_blk, (0, 2, 4, 1, 3, 5))                   # (N,2,2,H2,W2,C)
    x_blk = x_blk.reshape(N, 4, HW4, Cin)
    x_packed = jnp.pad(
        x_blk, ((0, 0), (0, 0), (0, HW4_p - HW4), (0, Cin_p - Cin)))

    out_packed = pl.pallas_call(
        transition_block1_kernel,
        out_shape=jax.ShapeDtypeStruct((N, HW4_p, Cout_p), jnp.float32),
        grid_spec=pltpu.PrefetchScalarGridSpec(
            num_scalar_prefetch=0,
            grid=(N, grid_s),
            in_specs=[
                pl.BlockSpec((1, 4, tile_s, Cin_p), lambda n, s: (n, 0, s, 0)),
                pl.BlockSpec((1, Cin_p), lambda n, s: (0, 0)),
                pl.BlockSpec((1, Cin_p), lambda n, s: (0, 0)),
                pl.BlockSpec((Cin_p, Cout_p), lambda n, s: (0, 0)),
            ],
            out_specs=pl.BlockSpec((1, tile_s, Cout_p), lambda n, s: (n, s, 0)),
        ),
        compiler_params=pltpu.CompilerParams(
            dimension_semantics=("parallel", "parallel"),
            vmem_limit_bytes=32 * 1024 * 1024),
    )(x_packed, scale_p, bias_p, w_bf16)

    # (N, HW4_p, Cout_p) -> (N, Cout, H//2, W//2), dropping all padding.
    out = out_packed[:, :HW4, :Cout].reshape(N, H2, W2, Cout)
    return jnp.transpose(out, (0, 3, 1, 2))


def reference_forward(x_nchw, gamma, beta, run_mean, run_var, weight_io,
                      eps=1e-5):
    """Plain-JAX reference mirroring the PyTorch module (eval mode, drop=0)."""
    N, Cin, H, W = x_nchw.shape
    Cout = weight_io.shape[1]
    xn = (x_nchw - run_mean[None, :, None, None]) / jnp.sqrt(
        run_var + eps)[None, :, None, None]
    xn = gamma[None, :, None, None] * xn + beta[None, :, None, None]
    h = jnp.maximum(xn, 0.0)
    y = jnp.einsum('nihw,io->nohw', h, weight_io)
    y = y.reshape(N, Cout, H // 2, 2, W // 2, 2).mean(axis=(3, 5))
    return y


if __name__ == "__main__":
    key = jax.random.PRNGKey(0)
    k_x, k_g, k_b, k_m, k_v, k_w = jax.random.split(key, 6)

    N, Cin, Cout, H, W = 2, 4, 8, 16, 16

    x = jax.random.normal(k_x, (N, Cin, H, W), dtype=jnp.float32)
    gamma = 1.0 + 0.1 * jax.random.normal(k_g, (Cin,), dtype=jnp.float32)
    beta = 0.1 * jax.random.normal(k_b, (Cin,), dtype=jnp.float32)
    run_mean = 0.1 * jax.random.normal(k_m, (Cin,), dtype=jnp.float32)
    run_var = 1.0 + 0.1 * jnp.abs(jax.random.normal(k_v, (Cin,), dtype=jnp.float32))
    # ConvTranspose2d(in, out, k=1) weight has shape (in, out, 1, 1); use (in, out).
    weight_io = 0.2 * jax.random.normal(k_w, (Cin, Cout), dtype=jnp.float32)

    out = transition_block1(x, gamma, beta, run_mean, run_var, weight_io)
    out = jax.block_until_ready(out)

    ref = reference_forward(x, gamma, beta, run_mean, run_var, weight_io)
    assert out.shape == (N, Cout, H // 2, W // 2), out.shape
    # Tolerance relaxed for the bf16 MXU operands (f32 accumulation).
    assert jnp.allclose(out, ref, atol=3e-2, rtol=3e-2), float(
        jnp.max(jnp.abs(out - ref)))

    print("KERNEL_OK")
</pallas_src>

<mosaic_0001>
module attributes {stable_mosaic.version = 11 : i64} {
  func.func @transition_block1_kernel(%arg0: i32, %arg1: i32, %arg2: memref<1x4x64x128xbf16, #tpu.memory_space<vmem>>, %arg3: memref<1x128xf32, #tpu.memory_space<vmem>>, %arg4: memref<1x128xf32, #tpu.memory_space<vmem>>, %arg5: memref<128x128xbf16, #tpu.memory_space<vmem>>, %arg6: memref<1x64x128xf32, #tpu.memory_space<vmem>>) attributes {dimension_semantics = [#tpu.dimension_semantics<parallel>, #tpu.dimension_semantics<parallel>], iteration_bounds = array<i64: 2, 1>, scalar_prefetch = 0 : i64, scratch_operands = 0 : i64, tpu.core_type = #tpu.core_type<tc>, window_params = [{transform_indices = @transform_0, window_bounds = array<i64: 1, 4, 64, 128>}, {pipeline_mode = #tpu.pipeline_mode<synchronous>, transform_indices = @transform_1, window_bounds = array<i64: 1, 128>}, {pipeline_mode = #tpu.pipeline_mode<synchronous>, transform_indices = @transform_2, window_bounds = array<i64: 1, 128>}, {pipeline_mode = #tpu.pipeline_mode<synchronous>, transform_indices = @transform_3, window_bounds = array<i64: 128, 128>}, {transform_indices = @transform_4, window_bounds = array<i64: 1, 64, 128>}]} {
    %c0 = arith.constant 0 : index
    %c0_0 = arith.constant 0 : index
    %c0_1 = arith.constant 0 : index
    %c0_2 = arith.constant 0 : index
    %0 = vector.load %arg2[%c0, %c0_0, %c0_1, %c0_2] : memref<1x4x64x128xbf16, #tpu.memory_space<vmem>>, vector<1x4x64x128xbf16>
    %1 = vector.shape_cast %0 : vector<1x4x64x128xbf16> to vector<4x64x128xbf16>
    %c0_3 = arith.constant 0 : index
    %c0_4 = arith.constant 0 : index
    %2 = vector.load %arg3[%c0_3, %c0_4] : memref<1x128xf32, #tpu.memory_space<vmem>>, vector<1x128xf32>
    %c0_5 = arith.constant 0 : index
    %c0_6 = arith.constant 0 : index
    %3 = vector.load %arg4[%c0_5, %c0_6] : memref<1x128xf32, #tpu.memory_space<vmem>>, vector<1x128xf32>
    %4 = vector.extract_strided_slice %1 {offsets = [0, 0, 0], sizes = [1, 64, 128], strides = [1, 1, 1]} : vector<4x64x128xbf16> to vector<1x64x128xbf16>
    %5 = vector.shape_cast %4 : vector<1x64x128xbf16> to vector<64x128xbf16>
    %6 = arith.extf %5 : vector<64x128xbf16> to vector<64x128xf32>
    %7 = vector.broadcast %2 : vector<1x128xf32> to vector<64x128xf32>
    %8 = arith.mulf %6, %7 : vector<64x128xf32>
    %9 = vector.broadcast %3 : vector<1x128xf32> to vector<64x128xf32>
    %10 = arith.addf %8, %9 : vector<64x128xf32>
    %cst = arith.constant 0.000000e+00 : f32
    %11 = vector.broadcast %cst : f32 to vector<64x128xf32>
    %12 = arith.maximumf %10, %11 : vector<64x128xf32>
    %13 = vector.extract_strided_slice %1 {offsets = [1, 0, 0], sizes = [1, 64, 128], strides = [1, 1, 1]} : vector<4x64x128xbf16> to vector<1x64x128xbf16>
    %14 = vector.shape_cast %13 : vector<1x64x128xbf16> to vector<64x128xbf16>
    %15 = arith.extf %14 : vector<64x128xbf16> to vector<64x128xf32>
    %16 = vector.broadcast %2 : vector<1x128xf32> to vector<64x128xf32>
    %17 = arith.mulf %15, %16 : vector<64x128xf32>
    %18 = vector.broadcast %3 : vector<1x128xf32> to vector<64x128xf32>
    %19 = arith.addf %17, %18 : vector<64x128xf32>
    %cst_7 = arith.constant 0.000000e+00 : f32
    %20 = vector.broadcast %cst_7 : f32 to vector<64x128xf32>
    %21 = arith.maximumf %19, %20 : vector<64x128xf32>
    %22 = arith.addf %12, %21 : vector<64x128xf32>
    %23 = vector.extract_strided_slice %1 {offsets = [2, 0, 0], sizes = [1, 64, 128], strides = [1, 1, 1]} : vector<4x64x128xbf16> to vector<1x64x128xbf16>
    %24 = vector.shape_cast %23 : vector<1x64x128xbf16> to vector<64x128xbf16>
    %25 = arith.extf %24 : vector<64x128xbf16> to vector<64x128xf32>
    %26 = vector.broadcast %2 : vector<1x128xf32> to vector<64x128xf32>
    %27 = arith.mulf %25, %26 : vector<64x128xf32>
    %28 = vector.broadcast %3 : vector<1x128xf32> to vector<64x128xf32>
    %29 = arith.addf %27, %28 : vector<64x128xf32>
    %cst_8 = arith.constant 0.000000e+00 : f32
    %30 = vector.broadcast %cst_8 : f32 to vector<64x128xf32>
    %31 = arith.maximumf %29, %30 : vector<64x128xf32>
    %32 = arith.addf %22, %31 : vector<64x128xf32>
    %33 = vector.extract_strided_slice %1 {offsets = [3, 0, 0], sizes = [1, 64, 128], strides = [1, 1, 1]} : vector<4x64x128xbf16> to vector<1x64x128xbf16>
    %34 = vector.shape_cast %33 : vector<1x64x128xbf16> to vector<64x128xbf16>
    %35 = arith.extf %34 : vector<64x128xbf16> to vector<64x128xf32>
    %36 = vector.broadcast %2 : vector<1x128xf32> to vector<64x128xf32>
    %37 = arith.mulf %35, %36 : vector<64x128xf32>
    %38 = vector.broadcast %3 : vector<1x128xf32> to vector<64x128xf32>
    %39 = arith.addf %37, %38 : vector<64x128xf32>
    %cst_9 = arith.constant 0.000000e+00 : f32
    %40 = vector.broadcast %cst_9 : f32 to vector<64x128xf32>
    %41 = arith.maximumf %39, %40 : vector<64x128xf32>
    %42 = arith.addf %32, %41 : vector<64x128xf32>
    %43 = arith.truncf %42 : vector<64x128xf32> to vector<64x128xbf16>
    %c0_10 = arith.constant 0 : index
    %c0_11 = arith.constant 0 : index
    %44 = vector.load %arg5[%c0_10, %c0_11] : memref<128x128xbf16, #tpu.memory_space<vmem>>, vector<128x128xbf16>
    %cst_12 = arith.constant dense<0.000000e+00> : vector<64x128xf32>
    %45 = tpu.matmul %43, %44, %cst_12 {dimension_numbers = #tpu.dot_dimension_numbers<[1], [0], [0], [1], [0, 0, 1, 1], [], []>} : vector<64x128xbf16>, vector<128x128xbf16>, vector<64x128xf32> -> vector<64x128xf32>
    %c0_13 = arith.constant 0 : index
    %c0_14 = arith.constant 0 : index
    %c0_15 = arith.constant 0 : index
    %46 = vector.load %arg6[%c0_13, %c0_14, %c0_15] : memref<1x64x128xf32, #tpu.memory_space<vmem>>, vector<1x64x128xf32>
    %47 = vector.shape_cast %46 : vector<1x64x128xf32> to vector<64x128xf32>
    %48 = vector.shape_cast %45 : vector<64x128xf32> to vector<1x64x128xf32>
    tpu.vector_store %arg6[%c0_13, %c0_14, %c0_15], %48 {strides = array<i32>} : memref<1x64x128xf32, #tpu.memory_space<vmem>>, vector<1x64x128xf32>,
    return
  }
  func.func @transform_0(%arg0: i32, %arg1: i32) -> (i32, i32, i32, i32) {
    %c0_i32 = arith.constant 0 : i32
    %c0_i32_0 = arith.constant 0 : i32
    %c0_i32_1 = arith.constant 0 : i32
    return %arg0, %c0_i32, %arg1, %c0_i32_0 : i32, i32, i32, i32
  }
  func.func @transform_1(%arg0: i32, %arg1: i32) -> (i32, i32) {
    %c0_i32 = arith.constant 0 : i32
    %c0_i32_0 = arith.constant 0 : i32
    %c0_i32_1 = arith.constant 0 : i32
    return %c0_i32, %c0_i32_0 : i32, i32
  }
  func.func @transform_2(%arg0: i32, %arg1: i32) -> (i32, i32) {
    %c0_i32 = arith.constant 0 : i32
    %c0_i32_0 = arith.constant 0 : i32
    %c0_i32_1 = arith.constant 0 : i32
    return %c0_i32, %c0_i32_0 : i32, i32
  }
  func.func @transform_3(%arg0: i32, %arg1: i32) -> (i32, i32) {
    %c0_i32 = arith.constant 0 : i32
    %c0_i32_0 = arith.constant 0 : i32
    %c0_i32_1 = arith.constant 0 : i32
    return %c0_i32, %c0_i32_0 : i32, i32
  }
  func.func @transform_4(%arg0: i32, %arg1: i32) -> (i32, i32, i32) {
    %c0_i32 = arith.constant 0 : i32
    %c0_i32_0 = arith.constant 0 : i32
    return %arg0, %arg1, %c0_i32 : i32, i32, i32
  }
}

</mosaic_0001>

<bundles_post_ra>
// kernel: transition_block1.1
= control target key start
LH: loop header
LB: loop body
LE: loop exit
PB: predicated region body
PF: predicated region fallthrough
CT: control target
= control target key end

     0   :  { %s899_s15 = smov 0   ;;  %s901_s16 = smov 0   ;;  %s1056_s0 = inlined_call_operand.vmem [shape: bf16[2,4,64,128], index: 0, kind: input, shape index: {}]   ;;  %s1057_s1 = inlined_call_operand.vmem [shape: f32[1,128], index: 1, kind: input, shape index: {}]   ;;  %s1058_s2 = inlined_call_operand.vmem [shape: f32[1,128], index: 2, kind: input, shape index: {}]   ;;  %s1059_s3 = inlined_call_operand.vmem [shape: bf16[128,128], index: 3, kind: input, shape index: {}]   ;;  %s1060_s4 = inlined_call_operand.vmem [shape: f32[2,64,128], index: 4, kind: output, shape index: {}]  }
   0x1   :  { %s903_s17 = smov 0  }
   0x2 LB: > { %s26_s18 = sadd.s32 1, %s868_s16  ;;  %p668_p0 = scmp.ge.s32.totalorder %s872_s17, 1  ;;  %s872_s17 = sphi %s903_s17, %s14_s17   ;;  %s868_s16 = sphi %s901_s16, %s1062_s16   ;;  %s864_s15 = sphi %s899_s15, %s1061_s15  }
   0x3   : > { %p28_p1 = scmp.ge.s32.totalorder %s26_s18, 2  ;;  %p183_p2 = scmp.lt.s32.totalorder %s872_s17, 3 }
   0x5   : > { %s1064_s18 = smov (%p28_p1, %s26_s18), 0  ;;  %p184_p3 = pnand %p668_p0, %p183_p2 }
   0x6   : > { %p218_p4 = scmp.lt.s32.totalorder (!%p184_p3), %s864_s15, 1 }
   0x7   : > { %187 = sbr.rel (%p184_p3) target bundleno = 261 (0x105), region = 36 }
   0xc   : > { %v842_v0 = vld [vmem:[%s1059_s3 + $0x38] sm:$0xff]   ;;  %v843_v1 = vld [vmem:[%s1059_s3 + $0x30] sm:$0xff]   ;;  %s1066_s15 = smov (!%p218_p4, %s864_s15), 1  ;;  %v844_v2 = vld [vmem:[%s1059_s3 + $0x28] sm:$0xff]  }
   0xd   : > { %778 = vmatprep.subr.bf16.mxu0 %v842_v0  ;;  %802 = vmatprep.subr.bf16.mxu1 %v842_v0  ;;  %s685_s25 = sshll.u32 %s1066_s15, 7  ;;  %v845_v3 = vld [vmem:[%s1059_s3 + $0x20] sm:$0xff]   ;;  %v846_v23 = vld [vmem:[%s1059_s3 + $0x18] sm:$0xff]   ;;  %v847_v42 = vld [vmem:[%s1059_s3 + $0x10] sm:$0xff]   ;;  %s686_s21 = sshll.u32 %s1066_s15, 6 }
   0xe   : > { %779 = vmatpush3.bf16.msra.mxu0 %v842_v0  ;;  %810 = vmatpush3.bf16.msra.mxu1 %v842_v0  ;;  %s932_s28 = scalar_lea.vmem %s1056_s0, %s685_s25  ;;  %v944_v12 = vld [vmem:[%s1057_s1] ss:$0 sm:$0xff]  ;;  %v848_v61 = vld [vmem:[%s1059_s3 + $0x8] sm:$0xff]   ;;  %s235_s24 = scalar_lea.vmem %s1060_s4, %s686_s21 }
   0xf   : > { %780 = vmatprep.subr.bf16.mxu0 %v843_v1  ;;  %803 = vmatprep.subr.bf16.mxu1 %v843_v1  ;;  %v688_v4 = vld [vmem:[%s932_s28] sm:$0xff]   ;;  %v752_v18 = vld [vmem:[%s932_s28 + $0x10] sm:$0xff]   ;;  %v978_v52 = vld [vmem:[%s932_s28 + $0x8] sm:$0xff]  }
  0x10   : > { %v754_v5 = vld [vmem:[%s932_s28 + $0x20] sm:$0xff]   ;;  %v689_v7 = vunpack.c.l.bf16 %v688_v4  ;;  %v690_v8 = vunpack.c.h.bf16 %v688_v4  ;;  %v697_v22 = vunpack.c.l.bf16 %v752_v18  ;;  %v698_v27 = vunpack.c.h.bf16 %v752_v18  ;;  %v756_v36 = vld [vmem:[%s932_s28 + $0x30] sm:$0xff]  }
  0x11   : > { %v758_v6 = vld [vmem:[%s932_s28 + $0x40] sm:$0xff]   ;;  %v705_v9 = vunpack.c.l.bf16 %v754_v5  ;;  %v706_v10 = vunpack.c.h.bf16 %v754_v5  ;;  %v760_v41 = vld [vmem:[%s932_s28 + $0x50] sm:$0xff]   ;;  %v713_v50 = vunpack.c.l.bf16 %v756_v36  ;;  %v714_v51 = vunpack.c.h.bf16 %v756_v36 }
  0x12   : > { %781 = vmatpush3.bf16.msra.mxu0 %v843_v1  ;;  %811 = vmatpush3.bf16.msra.mxu1 %v843_v1  ;;  %v762_v11 = vld [vmem:[%s932_s28 + $0x60] sm:$0xff]   ;;  %v721_v13 = vunpack.c.l.bf16 %v758_v6  ;;  %v722_v14 = vunpack.c.h.bf16 %v758_v6  ;;  %v286_v19 = vmul.f32 %v689_v7, %v944_v12  ;;  %v287_v20 = vmul.f32 %v690_v8, %v944_v12  ;;  %v764_v47 = vld [vmem:[%s932_s28 + $0x70] sm:$0xff]  }
  0x13   : > { %782 = vmatprep.subr.bf16.mxu0 %v844_v2  ;;  %804 = vmatprep.subr.bf16.mxu1 %v844_v2  ;;  %v737_v15 = vunpack.c.l.bf16 %v762_v11  ;;  %v738_v16 = vunpack.c.h.bf16 %v762_v11  ;;  %v949_v17 = vld [vmem:[%s1058_s2] ss:$0 sm:$0xff]  ;;  %v324_v21 = vmul.f32 %v705_v9, %v944_v12  ;;  %v325_v24 = vmul.f32 %v706_v10, %v944_v12 }
  0x14   : > { %v364_v25 = vmul.f32 %v721_v13, %v944_v12  ;;  %v365_v26 = vmul.f32 %v722_v14, %v944_v12  ;;  %v300_v28 = vadd.f32 %v949_v17, %v286_v19  ;;  %v301_v29 = vadd.f32 %v949_v17, %v287_v20 }
  0x15   : > { %v332_v30 = vadd.f32 %v949_v17, %v324_v21  ;;  %v404_v31 = vmul.f32 %v737_v15, %v944_v12  ;;  %v333_v32 = vadd.f32 %v949_v17, %v325_v24  ;;  %v405_v35 = vmul.f32 %v738_v16, %v944_v12  ;;  %v755_v15 = vld [vmem:[%s932_s28 + $0x28] sm:$0xff]   ;;  %v849_v16 = vld [vmem:[%s1059_s3] sm:$0xff]  }
  0x16   : > { %783 = vmatpush3.bf16.msra.mxu0 %v844_v2  ;;  %812 = vmatpush3.bf16.msra.mxu1 %v844_v2  ;;  %v372_v33 = vadd.f32 %v949_v17, %v364_v25  ;;  %v373_v34 = vadd.f32 %v949_v17, %v365_v26  ;;  %v308_v37 = vmax.f32 %v300_v28, 0.0  ;;  %v309_v38 = vmax.f32 %v301_v29, 0.0  ;;  %v759_v26 = vld [vmem:[%s932_s28 + $0x48] sm:$0xff]  }
  0x17   : > { %784 = vmatprep.subr.bf16.mxu0 %v845_v3  ;;  %805 = vmatprep.subr.bf16.mxu1 %v845_v3  ;;  %v340_v39 = vmax.f32 %v332_v30, 0.0  ;;  %v412_v40 = vadd.f32 %v949_v17, %v404_v31  ;;  %v341_v43 = vmax.f32 %v333_v32, 0.0  ;;  %v413_v46 = vadd.f32 %v949_v17, %v405_v35 }
  0x18   : > { %v380_v44 = vmax.f32 %v372_v33, 0.0  ;;  %v381_v45 = vmax.f32 %v373_v34, 0.0  ;;  %v729_v55 = vunpack.c.l.bf16 %v760_v41  ;;  %v730_v56 = vunpack.c.h.bf16 %v760_v41 }
  0x19   : > { %v348_v48 = vadd.f32 %v340_v39, %v308_v37  ;;  %v420_v49 = vmax.f32 %v412_v40, 0.0  ;;  %v349_v53 = vadd.f32 %v341_v43, %v309_v38  ;;  %v421_v54 = vmax.f32 %v413_v46, 0.0  ;;  %v753_v40 = vld [vmem:[%s932_s28 + $0x18] sm:$0xff]  }
  0x1a   : > { %785 = vmatpush3.bf16.msra.mxu0 %v845_v3  ;;  %813 = vmatpush3.bf16.msra.mxu1 %v845_v3  ;;  %v745_v58 = vunpack.c.l.bf16 %v764_v47  ;;  %v746_v59 = vunpack.c.h.bf16 %v764_v47  ;;  %v290_v60 = vmul.f32 %v697_v22, %v944_v12  ;;  %v291_v63 = vmul.f32 %v698_v27, %v944_v12  ;;  %v763_v27 = vld [vmem:[%s932_s28 + $0x68] sm:$0xff]  }
  0x1b   : > { %786 = vmatprep.subr.bf16.mxu0 %v846_v23  ;;  %806 = vmatprep.subr.bf16.mxu1 %v846_v23  ;;  %v388_v57 = vadd.f32 %v380_v44, %v348_v48  ;;  %v389_v62 = vadd.f32 %v381_v45, %v349_v53  ;;  %v328_v0 = vmul.f32 %v713_v50, %v944_v12  ;;  %v693_v1 = vunpack.c.l.bf16 %v978_v52 }
  0x1c   : > { %v304_v3 = vadd.f32 %v949_v17, %v290_v60  ;;  %v329_v4 = vmul.f32 %v714_v51, %v944_v12  ;;  %v368_v5 = vmul.f32 %v729_v55, %v944_v12  ;;  %v305_v7 = vadd.f32 %v949_v17, %v291_v63 }
  0x1d   : > { %v428_v2 = vadd.f32 %v420_v49, %v388_v57  ;;  %v429_v6 = vadd.f32 %v421_v54, %v389_v62  ;;  %v336_v8 = vadd.f32 %v949_v17, %v328_v0  ;;  %v369_v9 = vmul.f32 %v730_v56, %v944_v12 }
  0x1e   : > { %787 = vmatpush3.bf16.msra.mxu0 %v846_v23  ;;  %814 = vmatpush3.bf16.msra.mxu1 %v846_v23  ;;  %v312_v10 = vmax.f32 %v304_v3, 0.0  ;;  %v337_v11 = vadd.f32 %v949_v17, %v329_v4  ;;  %v376_v13 = vadd.f32 %v949_v17, %v368_v5  ;;  %v408_v14 = vmul.f32 %v745_v58, %v944_v12 }
  0x1f   : > { %788 = vmatprep.subr.bf16.mxu0 %v847_v42  ;;  %807 = vmatprep.subr.bf16.mxu1 %v847_v42  ;;  %v436_v18 = vpack.c.bf16 %v429_v6, %v428_v2  ;;  %v313_v19 = vmax.f32 %v305_v7, 0.0  ;;  %v344_v20 = vmax.f32 %v336_v8, 0.0  ;;  %v377_v21 = vadd.f32 %v949_v17, %v369_v9  ;;  %v761_v2 = vld [vmem:[%s932_s28 + $0x58] sm:$0xff]  }
  0x20   : > { %v345_v22 = vmax.f32 %v337_v11, 0.0  ;;  %v384_v23 = vmax.f32 %v376_v13, 0.0  ;;  %v409_v24 = vmul.f32 %v746_v59, %v944_v12  ;;  %v416_v25 = vadd.f32 %v949_v17, %v408_v14  ;;  %v765_v7 = vld [vmem:[%s932_s28 + $0x78] sm:$0xff]  }
  0x21   : > { %794 = vmatprep.mubr.bf16.mxu0 %v436_v18  ;;  %v352_v28 = vadd.f32 %v344_v20, %v312_v10  ;;  %v385_v29 = vmax.f32 %v377_v21, 0.0  ;;  %v694_v30 = vunpack.c.h.bf16 %v978_v52  ;;  %v709_v31 = vunpack.c.l.bf16 %v755_v15 }
  0x22   : > { %789 = vmatpush3.bf16.msra.mxu0 %v847_v42  ;;  %815 = vmatpush3.bf16.msra.mxu1 %v847_v42  ;;  %v353_v32 = vadd.f32 %v345_v22, %v313_v19  ;;  %v417_v33 = vadd.f32 %v949_v17, %v409_v24  ;;  %v424_v34 = vmax.f32 %v416_v25, 0.0  ;;  %v710_v35 = vunpack.c.h.bf16 %v755_v15 }
  0x23   : > { %790 = vmatprep.subr.bf16.mxu0 %v848_v61  ;;  %808 = vmatprep.subr.bf16.mxu1 %v848_v61  ;;  %v392_v36 = vadd.f32 %v384_v23, %v352_v28  ;;  %v725_v37 = vunpack.c.l.bf16 %v759_v26  ;;  %v726_v38 = vunpack.c.h.bf16 %v759_v26  ;;  %v741_v39 = vunpack.c.l.bf16 %v763_v27 }
  0x24   : > { %v393_v41 = vadd.f32 %v385_v29, %v353_v32  ;;  %v425_v42 = vmax.f32 %v417_v33, 0.0  ;;  %v742_v43 = vunpack.c.h.bf16 %v763_v27  ;;  %v288_v44 = vmul.f32 %v693_v1, %v944_v12 }
  0x25   : > { %v432_v45 = vadd.f32 %v424_v34, %v392_v36  ;;  %v289_v46 = vmul.f32 %v694_v30, %v944_v12  ;;  %v326_v47 = vmul.f32 %v709_v31, %v944_v12  ;;  %v327_v48 = vmul.f32 %v710_v35, %v944_v12 }
  0x26   : > { %791 = vmatpush3.bf16.msra.mxu0 %v848_v61  ;;  %816 = vmatpush3.bf16.msra.mxu1 %v848_v61  ;;  %v433_v49 = vadd.f32 %v425_v42, %v393_v41  ;;  %v302_v50 = vadd.f32 %v949_v17, %v288_v44  ;;  %v366_v51 = vmul.f32 %v725_v37, %v944_v12  ;;  %v701_v52 = vunpack.c.l.bf16 %v753_v40  ;;  %v757_v61 = vld [vmem:[%s932_s28 + $0x38] sm:$0xff]  }
  0x27   : > { %792 = vmatprep.subr.bf16.mxu0 %v849_v16  ;;  %809 = vmatprep.subr.bf16.mxu1 %v849_v16  ;;  %v303_v53 = vadd.f32 %v949_v17, %v289_v46  ;;  %v334_v54 = vadd.f32 %v949_v17, %v326_v47  ;;  %v335_v55 = vadd.f32 %v949_v17, %v327_v48  ;;  %v702_v6 = vunpack.c.h.bf16 %v753_v40 }
  0x28   : > { %v367_v56 = vmul.f32 %v726_v38, %v944_v12  ;;  %v438_v57 = vpack.c.bf16 %v433_v49, %v432_v45  ;;  %v310_v58 = vmax.f32 %v302_v50, 0.0  ;;  %v374_v59 = vadd.f32 %v949_v17, %v366_v51 }
  0x29   : > { %v406_v60 = vmul.f32 %v741_v39, %v944_v12  ;;  %v311_v62 = vmax.f32 %v303_v53, 0.0  ;;  %v342_v63 = vmax.f32 %v334_v54, 0.0  ;;  %v343_v0 = vmax.f32 %v335_v55, 0.0 }
  0x2a   : > { %793 = vmatpush3.bf16.msra.mxu0 %v849_v16  ;;  %817 = vmatpush3.bf16.msra.mxu1 %v849_v16  ;;  %v375_v1 = vadd.f32 %v949_v17, %v367_v56  ;;  %v382_v3 = vmax.f32 %v374_v59, 0.0  ;;  %v407_v4 = vmul.f32 %v742_v43, %v944_v12  ;;  %v717_v11 = vunpack.c.l.bf16 %v757_v61 }
  0x2b   : > { %798 = vmatprep.mubr.bf16.mxu1 %v438_v57  ;;  %v414_v5 = vadd.f32 %v949_v17, %v406_v60  ;;  %v350_v8 = vadd.f32 %v342_v63, %v310_v58  ;;  %v351_v9 = vadd.f32 %v343_v0, %v311_v62  ;;  %v718_v15 = vunpack.c.h.bf16 %v757_v61 }
  0x2c   : > { %v383_v10 = vmax.f32 %v375_v1, 0.0  ;;  %v415_v13 = vadd.f32 %v949_v17, %v407_v4  ;;  %v733_v16 = vunpack.c.l.bf16 %v761_v2  ;;  %v734_v20 = vunpack.c.h.bf16 %v761_v2 }
  0x2d   : > { %v422_v14 = vmax.f32 %v414_v5, 0.0  ;;  %v390_v18 = vadd.f32 %v382_v3, %v350_v8  ;;  %v749_v21 = vunpack.c.l.bf16 %v765_v7  ;;  %v750_v23 = vunpack.c.h.bf16 %v765_v7 }
  0x2e   : > { %v391_v19 = vadd.f32 %v383_v10, %v351_v9  ;;  %v423_v22 = vmax.f32 %v415_v13, 0.0  ;;  %v292_v24 = vmul.f32 %v701_v52, %v944_v12  ;;  %v293_v25 = vmul.f32 %v702_v6, %v944_v12 }
  0x2f   : > { %v430_v26 = vadd.f32 %v422_v14, %v390_v18  ;;  %v330_v27 = vmul.f32 %v717_v11, %v944_v12  ;;  %v331_v28 = vmul.f32 %v718_v15, %v944_v12  ;;  %v370_v29 = vmul.f32 %v733_v16, %v944_v12 }
  0x30   : > { %v431_v30 = vadd.f32 %v423_v22, %v391_v19  ;;  %v306_v31 = vadd.f32 %v949_v17, %v292_v24  ;;  %v307_v32 = vadd.f32 %v949_v17, %v293_v25  ;;  %v371_v33 = vmul.f32 %v734_v20, %v944_v12 }
  0x31   : > { %v338_v34 = vadd.f32 %v949_v17, %v330_v27  ;;  %v339_v35 = vadd.f32 %v949_v17, %v331_v28  ;;  %v378_v36 = vadd.f32 %v949_v17, %v370_v29  ;;  %v410_v37 = vmul.f32 %v749_v21, %v944_v12 }
  0x32   : > { %v437_v38 = vpack.c.bf16 %v431_v30, %v430_v26  ;;  %v314_v39 = vmax.f32 %v306_v31, 0.0  ;;  %v315_v40 = vmax.f32 %v307_v32, 0.0  ;;  %v379_v41 = vadd.f32 %v949_v17, %v371_v33 }
  0x33   : > { %v346_v42 = vmax.f32 %v338_v34, 0.0  ;;  %v347_v43 = vmax.f32 %v339_v35, 0.0  ;;  %v386_v44 = vmax.f32 %v378_v36, 0.0  ;;  %v411_v45 = vmul.f32 %v750_v23, %v944_v12 }
  0x34   : > { %795 = vmatmul.mubr.bf16.vlgmr.msra.gmra.mxu0 %v437_v38  ;;  %v387_v46 = vmax.f32 %v379_v41, 0.0  ;;  %v418_v47 = vadd.f32 %v949_v17, %v410_v37 }
  0x35   : > { %v354_v48 = vadd.f32 %v346_v42, %v314_v39  ;;  %v355_v49 = vadd.f32 %v347_v43, %v315_v40  ;;  %v419_v50 = vadd.f32 %v949_v17, %v411_v45 }
  0x36   : > { %v426_v51 = vmax.f32 %v418_v47, 0.0 }
  0x37   : > { %v394_v52 = vadd.f32 %v386_v44, %v354_v48  ;;  %v395_v53 = vadd.f32 %v387_v46, %v355_v49  ;;  %v427_v54 = vmax.f32 %v419_v50, 0.0 }
  0x39   : > { %v434_v55 = vadd.f32 %v426_v51, %v394_v52  ;;  %v435_v56 = vadd.f32 %v427_v54, %v395_v53 }
  0x3b   : > { %v439_v57 = vpack.c.bf16 %v435_v56, %v434_v55 }
  0x3d   : > { %799 = vmatmul.mubr.bf16.vlgmr.msra.gmra.mxu1 %v439_v57 }
  0xf4   : > { %v796_v12 = vpop.f32.mrf.mxu0 }
  0xf5   : > { %571 = vst [vmem:[%s235_s24 + $0x10] sm:$0xff] %v796_v12 }
  0xf6   : > { %v538_v58 = vpop.f32.mrf.mxu0 }
  0xf7   : > { %569 = vst [vmem:[%s235_s24] sm:$0xff] %v538_v58 }
  0xf8   : > { %v797_v59 = vpop.f32.mrf.mxu0 }
  0xf9   : > { %572 = vst [vmem:[%s235_s24 + $0x18] sm:$0xff] %v797_v59 }
  0xfa   : > { %v541_v17 = vpop.f32.mrf.mxu0 }
  0xfb   : > { %570 = vst [vmem:[%s235_s24 + $0x8] sm:$0xff] %v541_v17 }
  0xfd   : > { %v800_v60 = vpop.f32.mrf.mxu1 }
  0xfe   : > { %575 = vst [vmem:[%s235_s24 + $0x30] sm:$0xff] %v800_v60 }
  0xff   : > { %v554_v61 = vpop.f32.mrf.mxu1 }
 0x100   : > { %573 = vst [vmem:[%s235_s24 + $0x20] sm:$0xff] %v554_v61 }
 0x101   : > { %v801_v62 = vpop.f32.mrf.mxu1 }
 0x102   : > { %576 = vst [vmem:[%s235_s24 + $0x38] sm:$0xff] %v801_v62 }
 0x103   : > { %v557_v63 = vpop.f32.mrf.mxu1 }
 0x104   : > { %574 = vst [vmem:[%s235_s24 + $0x28] sm:$0xff] %v557_v63 }
 0x105 PF: > { %s14_s17 = sadd.s32 1, %s872_s17   ;;  %s1061_s15 = smov %s868_s16 }
 0x106   : > { %p11_p5 = scmp.ge.s32.totalorder %s14_s17, 4   ;;  %s1062_s16 = smov %s1064_s18 }
 0x108   :  { %13 = sbr.rel (!%p11_p5) target bundleno = 2 (0x2), region = 66 }

</bundles_post_ra>
